<compile_context>
chip_gen: v7x
topology: tpu7x:2x2x1
jax: 0.10.0
libtpu: 0.0.40
codegen_flags: <defaults>
</compile_context>

<pallas_src>
import functools

import jax
import jax.numpy as jnp
from jax import lax
from jax.experimental import pallas as pl
from jax.experimental.pallas import tpu as pltpu

HIDDEN = 32


def _actor_kernel(bound, x_ref, w1_ref, b1_ref, wh_ref, bh_ref, out_ref):
    # Hidden layer, transposed so the batch is lane-dense:
    #   (32, TILE_B) = contract(W1[in,32] dim0, x[TILE_B,in] dim1)
    x = x_ref[...]
    ht = lax.dot_general(
        w1_ref[...], x,
        dimension_numbers=(((0,), (1,)), ((), ())),
        preferred_element_type=jnp.float32)
    ht = jnp.maximum(ht + b1_ref[...], 0.0)                     # (32, TILE_B) + (32, 1)

    # Fused mu/sigma heads: (2, 32) @ (32, TILE_B) -> (2, TILE_B), batch on lanes.
    pre = jnp.dot(wh_ref[...], ht, preferred_element_type=jnp.float32)
    pre = pre + bh_ref[...]                                     # + (2, 1)

    # Row 0 -> mu = bound * tanh(pre); row 1 -> sigma = softplus(pre)
    # (stable softplus: max(s, 0) + log1p(exp(-|s|)), matches torch.nn.Softplus)
    mu_rows = bound * jnp.tanh(pre)
    sp_rows = jnp.maximum(pre, 0.0) + jnp.log1p(jnp.exp(-jnp.abs(pre)))
    row = lax.broadcasted_iota(jnp.int32, pre.shape, 0)
    out_ref[...] = jnp.where(row == 0, mu_rows, sp_rows)        # (2, TILE_B)


def actor_forward(x, params, bound, *, tile_b=512):
    """x: (B, inDim) f32.  params: dict with fused weights.  Returns (mu, sigma), each (B, 1)."""
    B, in_dim = x.shape

    if B <= tile_b:
        tile, bp = B, B                      # single full-extent block along batch
    else:
        tile = tile_b
        bp = ((B + tile - 1) // tile) * tile
        if bp != B:                          # pad batch to a whole number of tiles
            x = jnp.pad(x, ((0, bp - B), (0, 0)))

    out = pl.pallas_call(
        functools.partial(_actor_kernel, float(bound)),
        out_shape=jax.ShapeDtypeStruct((2, bp), jnp.float32),
        grid=(bp // tile,),
        in_specs=[
            pl.BlockSpec((tile, in_dim), lambda i: (i, 0)),      # x tile
            pl.BlockSpec((in_dim, HIDDEN), lambda i: (0, 0)),    # W1 (resident)
            pl.BlockSpec((HIDDEN, 1), lambda i: (0, 0)),         # b1 (column, broadcasts on lanes)
            pl.BlockSpec((2, HIDDEN), lambda i: (0, 0)),         # fused head weights
            pl.BlockSpec((2, 1), lambda i: (0, 0)),              # fused head biases
        ],
        out_specs=pl.BlockSpec((2, tile), lambda i: (0, i)),     # lane-dense (2, B) slab
        compiler_params=pltpu.CompilerParams(
            dimension_semantics=("parallel",)),
    )(x, params["w1"], params["b1"], params["w_heads"], params["b_heads"])

    mu = out[0, :B].reshape(B, 1)
    sigma = out[1, :B].reshape(B, 1)
    return mu, sigma


def init_params(key, in_dim, hidden=HIDDEN):
    """Deterministic synthetic parameters (torch.nn.Linear init ranges), fused head layout."""
    ks = jax.random.split(key, 6)
    s1 = 1.0 / jnp.sqrt(in_dim)
    s2 = 1.0 / jnp.sqrt(hidden)
    w1 = jax.random.uniform(ks[0], (in_dim, hidden), jnp.float32, -s1, s1)
    b1 = jax.random.uniform(ks[1], (hidden, 1), jnp.float32, -s1, s1)   # stored as a column
    # torch mu_out.weight / sigma_out.weight are each (1, 32); stack rows -> (2, 32)
    w_mu = jax.random.uniform(ks[2], (1, hidden), jnp.float32, -s2, s2)
    b_mu = jax.random.uniform(ks[3], (1, 1), jnp.float32, -s2, s2)
    w_sg = jax.random.uniform(ks[4], (1, hidden), jnp.float32, -s2, s2)
    b_sg = jax.random.uniform(ks[5], (1, 1), jnp.float32, -s2, s2)
    return {
        "w1": w1,
        "b1": b1,                                           # (hidden, 1)
        "w_heads": jnp.concatenate([w_mu, w_sg], axis=0),   # (2, hidden): row0=mu, row1=sigma
        "b_heads": jnp.concatenate([b_mu, b_sg], axis=0),   # (2, 1)
    }


def reference_forward(x, params, bound):
    h = jnp.maximum(x @ params["w1"] + params["b1"].T, 0.0)
    pre = h @ params["w_heads"].T + params["b_heads"].T      # (B, 2)
    mu = bound * jnp.tanh(pre[:, :1])
    sigma = jax.nn.softplus(pre[:, 1:])
    return mu, sigma


if __name__ == "__main__":
    key = jax.random.PRNGKey(0)
    k_x, k_p = jax.random.split(key)

    IN_DIM, BOUND = 16, 2.0
    params = init_params(k_p, IN_DIM)

    # Tiled path: batch of 256 with 128-row tiles -> 2-step grid (pipelined, parallel).
    B = 256
    x = jax.random.normal(k_x, (B, IN_DIM), dtype=jnp.float32)
    mu, sigma = actor_forward(x, params, BOUND, tile_b=128)
    jax.block_until_ready((mu, sigma))

    mu_ref, sigma_ref = reference_forward(x, params, BOUND)
    assert mu.shape == (B, 1) and sigma.shape == (B, 1)
    assert jnp.allclose(mu, mu_ref, atol=1e-5, rtol=1e-5)
    assert jnp.allclose(sigma, sigma_ref, atol=1e-5, rtol=1e-5)

    # Small-batch path (single full-extent block, grid of 1).
    xs = jax.random.normal(k_x, (8, IN_DIM), dtype=jnp.float32)
    mus, sigmas = actor_forward(xs, params, BOUND)
    jax.block_until_ready((mus, sigmas))
    mur, sgr = reference_forward(xs, params, BOUND)
    assert jnp.allclose(mus, mur, atol=1e-5, rtol=1e-5)
    assert jnp.allclose(sigmas, sgr, atol=1e-5, rtol=1e-5)

    print("KERNEL_OK")
</pallas_src>

<mosaic_0001>
module attributes {stable_mosaic.version = 11 : i64} {
  func.func @_actor_kernel(%arg0: i32, %arg1: memref<128x16xf32, #tpu.memory_space<vmem>>, %arg2: memref<16x32xf32, #tpu.memory_space<vmem>>, %arg3: memref<32x1xf32, #tpu.memory_space<vmem>>, %arg4: memref<2x32xf32, #tpu.memory_space<vmem>>, %arg5: memref<2x1xf32, #tpu.memory_space<vmem>>, %arg6: memref<2x128xf32, #tpu.memory_space<vmem>>) attributes {dimension_semantics = [#tpu.dimension_semantics<parallel>], iteration_bounds = array<i64: 2>, scalar_prefetch = 0 : i64, scratch_operands = 0 : i64, tpu.core_type = #tpu.core_type<tc>, window_params = [{transform_indices = @transform_0, window_bounds = array<i64: 128, 16>}, {pipeline_mode = #tpu.pipeline_mode<synchronous>, transform_indices = @transform_1, window_bounds = array<i64: 16, 32>}, {pipeline_mode = #tpu.pipeline_mode<synchronous>, transform_indices = @transform_2, window_bounds = array<i64: 32, 1>}, {pipeline_mode = #tpu.pipeline_mode<synchronous>, transform_indices = @transform_3, window_bounds = array<i64: 2, 32>}, {pipeline_mode = #tpu.pipeline_mode<synchronous>, transform_indices = @transform_4, window_bounds = array<i64: 2, 1>}, {transform_indices = @transform_5, window_bounds = array<i64: 2, 128>}]} {
    %c0 = arith.constant 0 : index
    %c0_0 = arith.constant 0 : index
    %0 = vector.load %arg1[%c0, %c0_0] : memref<128x16xf32, #tpu.memory_space<vmem>>, vector<128x16xf32>
    %c0_1 = arith.constant 0 : index
    %c0_2 = arith.constant 0 : index
    %1 = vector.load %arg2[%c0_1, %c0_2] : memref<16x32xf32, #tpu.memory_space<vmem>>, vector<16x32xf32>
    %cst = arith.constant dense<0.000000e+00> : vector<32x128xf32>
    %2 = tpu.matmul %1, %0, %cst {dimension_numbers = #tpu.dot_dimension_numbers<[0], [1], [1], [0], [0, 1, 1, 0], [], []>} : vector<16x32xf32>, vector<128x16xf32>, vector<32x128xf32> -> vector<32x128xf32>
    %c0_3 = arith.constant 0 : index
    %c0_4 = arith.constant 0 : index
    %3 = vector.load %arg3[%c0_3, %c0_4] : memref<32x1xf32, #tpu.memory_space<vmem>>, vector<32x1xf32>
    %4 = vector.broadcast %3 : vector<32x1xf32> to vector<32x128xf32>
    %5 = arith.addf %2, %4 : vector<32x128xf32>
    %cst_5 = arith.constant 0.000000e+00 : f32
    %6 = vector.broadcast %cst_5 : f32 to vector<32x128xf32>
    %7 = arith.maximumf %5, %6 : vector<32x128xf32>
    %c0_6 = arith.constant 0 : index
    %c0_7 = arith.constant 0 : index
    %8 = vector.load %arg4[%c0_6, %c0_7] : memref<2x32xf32, #tpu.memory_space<vmem>>, vector<2x32xf32>
    %cst_8 = arith.constant dense<0.000000e+00> : vector<2x128xf32>
    %9 = tpu.matmul %8, %7, %cst_8 {dimension_numbers = #tpu.dot_dimension_numbers<[1], [0], [0], [1], [0, 0, 1, 1], [], []>} : vector<2x32xf32>, vector<32x128xf32>, vector<2x128xf32> -> vector<2x128xf32>
    %c0_9 = arith.constant 0 : index
    %c0_10 = arith.constant 0 : index
    %10 = vector.load %arg5[%c0_9, %c0_10] : memref<2x1xf32, #tpu.memory_space<vmem>>, vector<2x1xf32>
    %11 = vector.broadcast %10 : vector<2x1xf32> to vector<2x128xf32>
    %12 = arith.addf %9, %11 : vector<2x128xf32>
    %13 = math.tanh %12 : vector<2x128xf32>
    %cst_11 = arith.constant 2.000000e+00 : f32
    %14 = vector.broadcast %cst_11 : f32 to vector<2x128xf32>
    %15 = arith.mulf %14, %13 : vector<2x128xf32>
    %cst_12 = arith.constant 0.000000e+00 : f32
    %16 = vector.broadcast %cst_12 : f32 to vector<2x128xf32>
    %17 = arith.maximumf %12, %16 : vector<2x128xf32>
    %18 = math.absf %12 : vector<2x128xf32>
    %cst_13 = arith.constant 0.000000e+00 : f32
    %19 = vector.broadcast %cst_13 : f32 to vector<2x128xf32>
    %20 = arith.subf %19, %18 : vector<2x128xf32>
    %21 = math.exp %20 : vector<2x128xf32>
    %22 = math.log1p %21 : vector<2x128xf32>
    %23 = arith.addf %17, %22 : vector<2x128xf32>
    %24 = tpu.iota {dimensions = array<i32: 0>} : vector<2x128xi32>
    %c0_i32 = arith.constant 0 : i32
    %25 = vector.broadcast %c0_i32 : i32 to vector<2x128xi32>
    %26 = arith.cmpi eq, %24, %25 : vector<2x128xi32>
    %27 = arith.select %26, %15, %23 : vector<2x128xi1>, vector<2x128xf32>
    %c0_14 = arith.constant 0 : index
    %c0_15 = arith.constant 0 : index
    %28 = vector.load %arg6[%c0_14, %c0_15] : memref<2x128xf32, #tpu.memory_space<vmem>>, vector<2x128xf32>
    tpu.vector_store %arg6[%c0_14, %c0_15], %27 {strides = array<i32>} : memref<2x128xf32, #tpu.memory_space<vmem>>, vector<2x128xf32>,
    return
  }
  func.func @transform_0(%arg0: i32) -> (i32, i32) {
    %c0_i32 = arith.constant 0 : i32
    %c0_i32_0 = arith.constant 0 : i32
    return %arg0, %c0_i32 : i32, i32
  }
  func.func @transform_1(%arg0: i32) -> (i32, i32) {
    %c0_i32 = arith.constant 0 : i32
    %c0_i32_0 = arith.constant 0 : i32
    %c0_i32_1 = arith.constant 0 : i32
    return %c0_i32, %c0_i32_0 : i32, i32
  }
  func.func @transform_2(%arg0: i32) -> (i32, i32) {
    %c0_i32 = arith.constant 0 : i32
    %c0_i32_0 = arith.constant 0 : i32
    %c0_i32_1 = arith.constant 0 : i32
    return %c0_i32, %c0_i32_0 : i32, i32
  }
  func.func @transform_3(%arg0: i32) -> (i32, i32) {
    %c0_i32 = arith.constant 0 : i32
    %c0_i32_0 = arith.constant 0 : i32
    %c0_i32_1 = arith.constant 0 : i32
    return %c0_i32, %c0_i32_0 : i32, i32
  }
  func.func @transform_4(%arg0: i32) -> (i32, i32) {
    %c0_i32 = arith.constant 0 : i32
    %c0_i32_0 = arith.constant 0 : i32
    %c0_i32_1 = arith.constant 0 : i32
    return %c0_i32, %c0_i32_0 : i32, i32
  }
  func.func @transform_5(%arg0: i32) -> (i32, i32) {
    %c0_i32 = arith.constant 0 : i32
    %c0_i32_0 = arith.constant 0 : i32
    return %c0_i32, %arg0 : i32, i32
  }
}

</mosaic_0001>

<bundles_post_ra>
// kernel: tpu_custom_call.1
= control target key start
LH: loop header
LB: loop body
LE: loop exit
PB: predicated region body
PF: predicated region fallthrough
CT: control target
= control target key end

     0   :  { %10 = vsyncpa [#allocation3], 0  ;;  %s1118_s0 = inlined_call_operand.vmem [shape: f32[256,16], index: 0, kind: input, shape index: {}]   ;;  %s1119_s1 = inlined_call_operand.vmem [shape: f32[16,32], index: 1, kind: input, shape index: {}]   ;;  %s1120_s2 = inlined_call_operand.vmem [shape: f32[32,1], index: 2, kind: input, shape index: {}]   ;;  %s1121_s3 = inlined_call_operand.vmem [shape: f32[2,32], index: 3, kind: input, shape index: {}]   ;;  %s1122_s4 = inlined_call_operand.vmem [shape: f32[2,1], index: 4, kind: input, shape index: {}]   ;;  %s1123_s5 = inlined_call_operand.hbm [shape: f32[2,256], index: 5, kind: output, shape index: {}]  }
   0x1   :  { %12 = vsyncpa [#allocation3 + $0x1], 0  ;;  %s935_s18 = smov 0   ;;  %s937_s19 = smov 0  }
   0x2   :  { %s939_s20 = smov 0   ;;  %s941_s21 = smov 0  }
   0x3 LB: > { %s956_s22 = sadd.s32 4294967295, %s898_s21   ;;  %s625_s23 = sadd.s32 4294967294, %s898_s21   ;;  %s898_s21 = sphi %s941_s21, %s1131_s21   ;;  %s894_s20 = sphi %s939_s20, %s1130_s20   ;;  %s890_s19 = sphi %s937_s19, %s1129_s19   ;;  %s886_s18 = sphi %s935_s18, %s1128_s18  }
   0x4   : > { %s960_s24 = sadd.s32 1, %s898_s21   ;;  %s135_s25 = sadd.s32 1, %s894_s20 }
   0x5   : > { %s132_s26 = ssub.s32 %s898_s21, %s960_s24  ;;  %p145_p0 = scmp.ne.s32.totalorder %s894_s20, %s890_s19 }
   0x6   : > { %p133_p1 = scmp.eq.s32.totalorder %s132_s26, 0  ;;  %p146_p2 = scmp.eq.s32.totalorder %s956_s22, 1 }
   0x7   : > { %p151_p3 = scmp.ne.s32.totalorder %s890_s19, %s886_s18  ;;  %p152_p4 = scmp.eq.s32.totalorder %s625_s23, 1 }
   0x8   : > { %s971_s27 = scalar_select %p133_p1, %s894_s20, %s135_s25  }
   0x9   : > { %p973_p5 = por %p146_p2, %p145_p0  ;;  %p977_p6 = por %p152_p4, %p151_p3 }
   0xa   : > { %p628_p7 = scmp.ge.s32.totalorder %s898_s21, 1  ;;  %p191_p8 = scmp.lt.s32.totalorder %s898_s21, 3 }
   0xc   : > { %p192_p9 = pnand %p628_p7, %p191_p8 }
   0xd   : > { %v241_v0 = vld [vmem:[%s1119_s1] sm:$0xff] (!%p192_p9)  ;;  %s630_s7 = sshll.u32 (!%p192_p9), %s956_s22, 4  ;;  %v242_v1 = vld [vmem:[%s1119_s1 + $0x8] sm:$0xff] (!%p192_p9)  ;;  %vm299_vm0 = vcmask (!%p192_p9), 130048   ;;  %v900_v12 = vmov (!%p192_p9), 0   ;;  %v246_v17 = vld [vmem:[%s1120_s2 + $0x18] sm:$0xff] (!%p192_p9) }
   0xe   : > { %195 = sbr.rel (%p192_p9) target bundleno = 641 (0x281), region = 40  ;;  %267 = vxpose.xlu0.b32.start [1/2] (short) (narrow) (!%p192_p9), %v241_v0, 32  ;;  %p220_p10 = scmp.lt.s32.totalorder (!%p192_p9), %s630_s7, 31  ;;  %vm997_vm1 = vmpackc.low (!%p192_p9), %vm299_vm0, %vm299_vm0  ;;  %v243_v11 = vld [vmem:[%s1120_s2] sm:$0xff] (!%p192_p9)  ;;  %828 = vset.pattern.permute.xlu1 (!%p192_p9), %v900_v12  ;;  %v244_v14 = vld [vmem:[%s1120_s2 + $0x8] sm:$0xff] (!%p192_p9)  ;;  %v901_v37 = vmov (!%p192_p9), 0.0|0.0  }
   0xf   : > { %249 = vperm.xlu1 (!%p192_p9), %828, %v243_v11   ;;  %v450_v19 = vld [vmem:[%s1122_s4] sm:$0x3] (!%p192_p9)  ;;  %v245_v29 = vld [vmem:[%s1120_s2 + $0x10] sm:$0xff] (!%p192_p9)  ;;  %779 = vmatprep.subr.bf16.mxu1 (!%p192_p9), %v901_v37  ;;  %vm902_vm2 = vmmov (!%p192_p9), 0   ;;  %v903_v38 = vmov (!%p192_p9), 0.0   ;;  %vm456_vm3 = vcmask (!%p192_p9), 261120  }
  0x10   : > { %728 = vmatprep.mubr.msk.f32.mxu1 (!%p192_p9), %vm902_vm2, %v903_v38  ;;  %v449_v57 = vld [vmem:[%s1121_s3] sm:$0x3] (!%p192_p9)  ;;  %s654_s12 = sshll.u32 (!%p192_p9), %s956_s22, 5  ;;  %s904_s25 = smov (!%p192_p9), [#allocation2]  }
  0x11   : > { %s1076_s17 = scalar_lea.hbm (!%p192_p9), %s1123_s5, %s654_s12  ;;  %s840_s26 = sshll.u32 (!%p192_p9), %s904_s25, 4  ;;  %s841_s26 = int_to_ptr.vmem [resolvable:$false] %s840_s26 }
  0x12   : > { %268 = vxpose.xlu0.b32.end [2/2] (short) (narrow) (!%p192_p9), %v242_v1, 32  ;;  %s842_s30 = scalar_lea.vmem (!%p192_p9), %s841_s26, 64 }
  0x13   : > { %254 = vperm.xlu1 (!%p192_p9), %828, %v244_v14  }
  0x15   : > { %s1133_s7 = smov (!%p220_p10, %s630_s7), 31 }
  0x16   : > { %s631_s10 = sshll.u32 %s1133_s7, 3 }
  0x17   : > { %s993_s13 = scalar_lea.vmem %s1118_s0, %s631_s10  ;;  %264 = vperm.xlu1 %828, %v246_v17   ;;  %s216_s10 = sand.u32 1, %s890_s19  }
  0x18   : > { %v225_v3 = vld [vmem:[%s993_s13] sm:$0xff]  ;;  %v226_v4 = vld [vmem:[%s993_s13 + $0x8] sm:$0xff]  ;;  %v227_v5 = vld [vmem:[%s993_s13 + $0x10] sm:$0xff]  ;;  %s629_s11 = sshll.u32 %s216_s10, 1  ;;  %s553_s23 = scalar_lea.sflag [#allocation3], %s216_s10 }
  0x19   : > { %v731_v6 = vpack.c.bf16 %v226_v4, %v225_v3  ;;  %v228_v7 = vld [vmem:[%s993_s13 + $0x18] sm:$0xff]  ;;  %v229_v9 = vld [vmem:[%s993_s13 + $0x20] sm:$0xff]  ;;  %v230_v10 = vld [vmem:[%s993_s13 + $0x28] sm:$0xff]  ;;  %v547_v4 = vlaneseq }
  0x1a   : > { %v737_v8 = vpack.c.bf16 %v228_v7, %v227_v5  ;;  %v743_v13 = vpack.c.bf16 %v230_v10, %v229_v9  ;;  %v231_v15 = vld [vmem:[%s993_s13 + $0x30] sm:$0xff]  ;;  %v232_v16 = vld [vmem:[%s993_s13 + $0x38] sm:$0xff]  ;;  %v233_v20 = vld [vmem:[%s993_s13 + $0x40] sm:$0xff] }
  0x1b   : > { %733 = vmatprep.subr.msk.bf16.mxu0 %vm997_vm1, %v731_v6  ;;  %v749_v18 = vpack.c.bf16 %v232_v16, %v231_v15  ;;  %453 = vperm.xlu1 %828, %v450_v19   ;;  %v234_v21 = vld [vmem:[%s993_s13 + $0x48] sm:$0xff]  ;;  %v235_v23 = vld [vmem:[%s993_s13 + $0x50] sm:$0xff]  ;;  %v236_v24 = vld [vmem:[%s993_s13 + $0x58] sm:$0xff]  ;;  %v548_v7 = vshrl.u32 %v547_v4, 7 }
  0x1c   : > { %736 = vmatpush3.bf16.xpose.msk.msra.mxu0 %vm997_vm1, %v731_v6  ;;  %v755_v22 = vpack.c.bf16 %v234_v21, %v233_v20  ;;  %v761_v25 = vpack.c.bf16 %v236_v24, %v235_v23  ;;  %v237_v26 = vld [vmem:[%s993_s13 + $0x60] sm:$0xff]  ;;  %v238_v27 = vld [vmem:[%s993_s13 + $0x68] sm:$0xff]  ;;  %v239_v30 = vld [vmem:[%s993_s13 + $0x70] sm:$0xff] }
  0x1d   : > { %739 = vmatprep.subr.msk.bf16.mxu0 %vm997_vm1, %v737_v8  ;;  %v767_v28 = vpack.c.bf16 %v238_v27, %v237_v26  ;;  %v240_v31 = vld [vmem:[%s993_s13 + $0x78] sm:$0xff]  ;;  %s218_s13 = scalar_lea.vmem [#allocation2], %s629_s11  ;;  %vm549_vm5 = vcmp.eq.s32.totalorder %v548_v7, 0 }
  0x1e   : > { %v773_v32 = vpack.c.bf16 %v240_v31, %v239_v30  ;;  %s566_s14 = sshll.u32 %s218_s13, 4  ;;  %s1078_s14 = int_to_ptr.vmem [resolvable:$true] %s566_s14 }
  0x1f   : > { %s836_s22 = scalar_lea.vmem %s1078_s14, 32  ;;  %p843_p0 = scmp.lt.s32.totalorder %s1078_s14, %s841_s26 }
  0x20   : > { %p837_p11 = scmp.ne.s32.totalorder %s1078_s14, %s836_s22  ;;  %p844_p1 = scmp.lt.s32.totalorder %s842_s30, %s836_s22 }
  0x22   : > { %p838_p12 = pnand %p837_p11, %p973_p5  ;;  %p845_p2 = por %p844_p1, %p843_p0 }
  0x24   : > { %742 = vmatpush3.bf16.xpose.msk.msra.mxu0 %vm997_vm1, %v737_v8  ;;  %p839_p13 = pneg %p838_p12 }
  0x25   : > { %745 = vmatprep.subr.msk.bf16.mxu0 %vm997_vm1, %v743_v13 }
  0x26   : > { %p846_p3 = pnand %p845_p2, %p839_p13 }
  0x2c   : > { %748 = vmatpush3.bf16.xpose.msk.msra.mxu0 %vm997_vm1, %v743_v13 }
  0x2d   : > { %751 = vmatprep.subr.msk.bf16.mxu0 %vm997_vm1, %v749_v18 }
  0x34   : > { %754 = vmatpush3.bf16.xpose.msk.msra.mxu0 %vm997_vm1, %v749_v18 }
  0x35   : > { %757 = vmatprep.subr.msk.bf16.mxu0 %vm997_vm1, %v755_v22 }
  0x3b   : > { %829 = vset.pattern.permute.xlu0 %v900_v12 }
  0x3c   : > { %760 = vmatpush3.bf16.xpose.msk.msra.mxu0 %vm997_vm1, %v755_v22 }
  0x3d   : > { %763 = vmatprep.subr.msk.bf16.mxu0 %vm997_vm1, %v761_v25 }
  0x43   : > { %259 = vperm.xlu0 %829, %v245_v29  }
  0x44   : > { %766 = vmatpush3.bf16.xpose.msk.msra.mxu0 %vm997_vm1, %v761_v25 }
  0x45   : > { %769 = vmatprep.subr.msk.bf16.mxu0 %vm997_vm1, %v767_v28 }
  0x4c   : > { %772 = vmatpush3.bf16.xpose.msk.msra.mxu0 %vm997_vm1, %v767_v28 }
  0x4d   : > { %775 = vmatprep.subr.msk.bf16.mxu0 %vm997_vm1, %v773_v32 }
  0x54   : > { %778 = vmatpush3.bf16.xpose.msk.msra.mxu0 %vm997_vm1, %v773_v32 }
  0x8e   : > { %v283_v33 = vpop.trf.xlu0  ;;  %v250_v39 = vpop.permute.xlu1 %249 }
  0x8f   : > { %714 = vmatprep.mubr.msk.f32.mxu0 %vm299_vm0, %v283_v33 }
  0x92   : > { %v284_v34 = vpop.trf.xlu0  ;;  %v255_v40 = vpop.permute.xlu1 %254 }
  0x93   : > { %715 = vmatmul.mubr.msk.f32.vlgmr.msra.gmra.mrb[0].mxu0 %vm299_vm0, %v284_v34 }
  0x96   : > { %v285_v35 = vpop.trf.xlu0  ;;  %v265_v49 = vpop.permute.xlu1 %264 }
  0x97   : > { %717 = vmatprep.mubr.msk.f32.mxu0 %vm299_vm0, %v285_v35 }
  0x9a   : > { %v286_v36 = vpop.trf.xlu0  ;;  %v454_v58 = vpop.permute.xlu1 %453 }
  0x9b   : > { %718 = vmatmul.mubr.msk.f32.gmra.mrb[2].mxu0 %vm299_vm0, %v286_v36 }
  0xc2   : > { %v260_v48 = vpop.permute.xlu0 %259 }
 0x166   : > { %v716_v41 = vpop.f32.mrb[0].mxu0 }
 0x167   : > { %v432_v42 = vadd.f32 %v716_v41, %v255_v40  ;;  %v426_v43 = vpop.f32.mrb[1].mxu0 }
 0x168   : > { %v427_v44 = vadd.f32 %v426_v43, %v250_v39 }
 0x169   : > { %v446_v45 = vmax.f32 %v432_v42, 0.0 }
 0x16a   : > { %v445_v46 = vmax.f32 %v427_v44, 0.0 }
 0x16c   : > { %v780_v47 = vpack.c.bf16 %v446_v45, %v445_v46 }
 0x16e   : > { %v719_v50 = vpop.f32.mrb[2].mxu0  ;;  %781 = vmatpush3.bf16.msra.mxu1 %v780_v47 }
 0x16f   : > { %v442_v51 = vadd.f32 %v719_v50, %v265_v49  ;;  %v436_v52 = vpop.f32.mrb[3].mxu0  ;;  %782 = vmatprep.subr.bf16.mxu1 %v901_v37 }
 0x170   : > { %v437_v53 = vadd.f32 %v436_v52, %v260_v48 }
 0x171   : > { %v448_v54 = vmax.f32 %v442_v51, 0.0 }
 0x172   : > { %v447_v55 = vmax.f32 %v437_v53, 0.0 }
 0x174   : > { %v783_v56 = vpack.c.bf16 %v448_v54, %v447_v55 }
 0x176   : > { %784 = vmatpush3.bf16.msra.mxu1 %v783_v56 }
 0x179   : > { %729 = vmatmul.mubr.msk.f32.vlgmr.msra.gmra.mrb[0].mxu1 %vm456_vm3, %v449_v57 }
 0x24c   : > { %v526_v59 = vpop.f32.mrb[0].mxu1 }
 0x24d   : > { %v527_v60 = vadd.f32 %v526_v59, %v454_v58  ;;  %v730_v61 = vpop.f32.mrb[1].mxu1 }
 0x24f   : > { %v533_v62 = vand.u32 2147483647, %v527_v60  ;;  %v532_v12 = vmax.f32 %v527_v60, 0.0 }
 0x251   : > { %v534_v63 = vsub.f32 0.0, %v533_v62 }
 0x253   : > { %v535_v0 = vmul.f32 1.442695, %v534_v63 }
 0x255   : > { %830 = vpow2.f32 %v535_v0 }
 0x25f   : > { %v831_v1 = vpop.eup %830 }
 0x260   : > { %v537_v2 = vadd.f32 1.0, %v831_v1  ;;  %v540_v3 = vmul.f32 -0.5, %v831_v1  ;;  %v543_v6 = vand.u32 2147483647, %v831_v1 }
 0x262   : > { %832 = vlog2.f32 %v537_v2  ;;  %v541_v5 = vadd.f32 1.0, %v540_v3  ;;  %vm544_vm4 = vcmp.lt.f32.partialorder %v543_v6, 0.0004427343 }
 0x263   : > { %834 = vtanh.f32 %v527_v60 }
 0x264   : > { %v542_v11 = vmul.f32 %v831_v1, %v541_v5 }
 0x26c   : > { %v833_v8 = vpop.eup %832 }
 0x26d   : > { %v835_v9 = vpop.eup %834  ;;  %v539_v10 = vmul.f32 0.6931472, %v833_v8 }
 0x26e   : > { %v531_v14 = vmul.f32 2.0, %v835_v9 }
 0x26f   : > { %v545_v13 = vsel %vm544_vm4, %v542_v11, %v539_v10 }
 0x270   : > { %v546_v15 = vadd.f32 %v545_v13, %v532_v12 }
 0x272   : > { %v550_v16 = vsel %vm549_vm5, %v531_v14, %v546_v15 }
 0x273   : > { %551 = vst [vmem:[%s218_s13] sm:$0x3] %v550_v16 }
 0x274   : > { %849 = shalt.err (!%p846_p3)
}
 0x275   : > { %s850_s6 = scalar_lea.hbm %s1076_s17, 32  ;;  %s854_s9 = scalar_lea.hbm %s1123_s5, 64 }
 0x276   : > { %p851_p4 = scmp.ne.s32.totalorder %s1076_s17, %s850_s6  ;;  %p855_p9 = scmp.lt.u32.totalorder %s1076_s17, %s1123_s5 }
 0x277   : > { %p856_p10 = scmp.lt.u32.totalorder %s854_s9, %s850_s6  ;;  %p858_p12 = scmp.lt.u32.totalorder %s850_s6, %s1076_s17 }
 0x278   : > { %p852_p7 = pnand %p851_p4, %p973_p5 }
 0x279   : > { %p857_p11 = por %p856_p10, %p855_p9 }
 0x27a   : > { %p853_p8 = pneg %p852_p7 }
 0x27b   : > { %p859_p13 = por %p858_p12, %p857_p11 }
 0x27d   : > { %p860_p0 = pnand %p859_p13, %p853_p8 }
 0x27f   : > { %863 = shalt.err (!%p860_p0)
}
 0x280   : > { %785 = dma.vmem_to_hbm [thread:$0]  (%p973_p5), %s1078_s14, 32, %s1076_s17, %s553_s23  }
 0x281 PF: > { %p791_p1 = scmp.ge.s32.totalorder %s898_s21, 2  ;;  %s578_s12 = sand.u32 1, %s886_s18  }
 0x282   : > { %s579_s13 = scalar_lea.sflag [#allocation3], %s578_s12 }
 0x283   : > { %p788_p2 = pnand %p791_p1, %p977_p6 }
 0x285   : > { %881 = dma.done.wait (!%p788_p2), %s579_s13, 32  }
 0x286   : > { %883 = vsyncadd (!%p788_p2), %s579_s13, 4294967264  ;;  %p15_p3 = scmp.ge.s32.totalorder %s960_s24, 4   ;;  %s1128_s18 = smov %s890_s19 }
 0x287   : > { %s1129_s19 = smov %s894_s20  ;;  %s1130_s20 = smov %s971_s27 }
 0x288   : > { %s1131_s21 = smov %s960_s24  ;;  %17 = sbr.rel (!%p15_p3) target bundleno = 3 (0x3), region = 75 }
 0x28f   :  { %584 = vsyncpa [#allocation3], 1 }
 0x290   :  { %586 = vsyncpa [#allocation3 + $0x1], 1 }

</bundles_post_ra>
